<compile_context>
chip_gen: v6e
topology: v6e:2x2x1
jax: 0.10.0
libtpu: 0.0.40
codegen_flags: <defaults>
</compile_context>

<pallas_src>
import functools

import jax
import jax.numpy as jnp
from jax.experimental import pallas as pl
from jax.experimental.pallas import tpu as pltpu

IN_FEATURES = 4
HIDDEN = 10
OUT_FEATURES = 3

# Block-diagonal / lane-dense packing constants.
SAMPLES_PER_ROW = 32                          # 4 features * 32 samples = 128 lanes
PACKED_IN = SAMPLES_PER_ROW * IN_FEATURES     # 128
PACKED_HID = SAMPLES_PER_ROW * HIDDEN         # 320
PACKED_OUT = SAMPLES_PER_ROW * OUT_FEATURES   # 96


def pack_params(w1, b1, w2, b2):
    """Expand fc1/fc2 params (native PyTorch (out,in) layout) into lane-dense
    block-diagonal form. Done once host-side, reused across forward calls.

      W1_bd (128, 320): 32 copies of w1.T (4,10) on the diagonal
      W2_bd (320,  96): 32 copies of w2.T (10,3) on the diagonal
      b1_bd (1, 320), b2_bd (1, 96): biases tiled per packed sample
    """
    w1t = w1.astype(jnp.float32).T            # (4, 10)
    w2t = w2.astype(jnp.float32).T            # (10, 3)
    eye = jnp.eye(SAMPLES_PER_ROW, dtype=jnp.float32)
    w1_bd = jnp.kron(eye, w1t)                # (128, 320)
    w2_bd = jnp.kron(eye, w2t)                # (320, 96)
    b1_bd = jnp.tile(b1.astype(jnp.float32), SAMPLES_PER_ROW).reshape(1, PACKED_HID)
    b2_bd = jnp.tile(b2.astype(jnp.float32), SAMPLES_PER_ROW).reshape(1, PACKED_OUT)
    return w1_bd, b1_bd, w2_bd, b2_bd


def mlp_kernel(x_ref, w1_ref, b1_ref, w2_ref, b2_ref, o_ref):
    x = x_ref[...]                                                   # (TR, 128)
    h = jnp.dot(x, w1_ref[...], preferred_element_type=jnp.float32)  # (TR, 320)
    h = jnp.maximum(h + b1_ref[...], 0.0)
    y = jnp.dot(h, w2_ref[...], preferred_element_type=jnp.float32)  # (TR, 96)
    o_ref[...] = (y + b2_ref[...]).astype(o_ref.dtype)


def _round_up(n, m):
    return ((n + m - 1) // m) * m


@functools.partial(jax.jit, static_argnames=("tb",))
def net_forward(x, packed_params, *, tb=64 * 1024):
    """Forward pass. x: (B, 4) f32 -> (B, 3) f32.

    tb = samples per grid step (the sweep knob). Default 64K samples
    == 2048 packed rows == 1 MiB of x payload per step.

    VMEM accounting at tb=64K (TR=2048 rows), f32, double-buffered, with lane
    padding to 128 included:
      x    2 * 2048*128*4  = 2   MiB
      out  2 * 2048*128*4  = 2   MiB   (96 lanes padded to 128 in VMEM)
      h    ~  2048*320*4   = 2.5 MiB   (kernel-internal intermediate)
      W/b  ~  0.3 MiB                  (resident: constant index_map)
      total ~7 MiB. vmem_limit_bytes is set to 32 MiB explicitly so larger tb
      values don't silently hit v5e's 16 MiB scoped default, while staying
      under v7x's 64 MiB physical per-TC VMEM.
    """
    w1_bd, b1_bd, w2_bd, b2_bd = packed_params
    B = x.shape[0]
    x = x.astype(jnp.float32)

    # Packed-row geometry.
    R = (B + SAMPLES_PER_ROW - 1) // SAMPLES_PER_ROW          # rows of 32 samples
    tr = max(8, _round_up(tb // SAMPLES_PER_ROW, 8))          # rows per grid step
    tr_eff = min(tr, _round_up(R, 8))
    Rp = _round_up(R, tr_eff)

    Bp = Rp * SAMPLES_PER_ROW
    if Bp != B:
        x = jnp.pad(x, ((0, Bp - B), (0, 0)))                 # padded rows discarded below
    x_pk = x.reshape(Rp, PACKED_IN)                           # free row-major reshape

    # At large B this is >= 2 steps, so the "parallel" axis feeds both v7x TCs.
    grid = (Rp // tr_eff,)

    out_pk = pl.pallas_call(
        mlp_kernel,
        out_shape=jax.ShapeDtypeStruct((Rp, PACKED_OUT), jnp.float32),
        grid_spec=pltpu.PrefetchScalarGridSpec(
            num_scalar_prefetch=0,
            grid=grid,
            in_specs=[
                # x: pipelined lane-dense (TR, 128) row blocks (contiguous DMA).
                pl.BlockSpec((tr_eff, PACKED_IN), lambda i: (i, 0)),
                # Params: constant block index -> DMA'd once, VMEM-resident.
                pl.BlockSpec((PACKED_IN, PACKED_HID), lambda i: (0, 0)),
                pl.BlockSpec((1, PACKED_HID), lambda i: (0, 0)),
                pl.BlockSpec((PACKED_HID, PACKED_OUT), lambda i: (0, 0)),
                pl.BlockSpec((1, PACKED_OUT), lambda i: (0, 0)),
            ],
            out_specs=pl.BlockSpec((tr_eff, PACKED_OUT), lambda i: (i, 0)),
        ),
        compiler_params=pltpu.CompilerParams(
            dimension_semantics=("parallel",),        # shard batch rows across TCs (v7x)
            vmem_limit_bytes=32 * 1024 * 1024,
        ),
    )(x_pk, w1_bd, b1_bd, w2_bd, b2_bd)

    # Free reshape back to per-sample layout, drop batch padding.
    return out_pk.reshape(Bp, OUT_FEATURES)[:B]


def reference_forward(x, w1, b1, w2, b2):
    h = jnp.maximum(x @ w1.T + b1, 0.0)
    return h @ w2.T + b2


if __name__ == "__main__":
    key = jax.random.PRNGKey(0)
    kx, k1, k2, k3, k4 = jax.random.split(key, 5)

    B = 150  # iris-sized batch of 4-feature rows (exercises the padding path)
    x = jax.random.normal(kx, (B, IN_FEATURES), dtype=jnp.float32)

    # Deterministic parameter init (roughly nn.Linear scale), native PyTorch
    # (out_features, in_features) layout.
    w1 = jax.random.uniform(k1, (HIDDEN, IN_FEATURES), jnp.float32, -0.5, 0.5)
    b1 = jax.random.uniform(k2, (HIDDEN,), jnp.float32, -0.5, 0.5)
    w2 = jax.random.uniform(k3, (OUT_FEATURES, HIDDEN), jnp.float32, -0.3, 0.3)
    b2 = jax.random.uniform(k4, (OUT_FEATURES,), jnp.float32, -0.3, 0.3)

    params = pack_params(w1, b1, w2, b2)   # pack once, reuse across calls
    out = jax.block_until_ready(net_forward(x, params))

    ref = reference_forward(x, w1, b1, w2, b2)
    assert out.shape == (B, OUT_FEATURES)
    assert jnp.allclose(out, ref, atol=1e-4, rtol=1e-4), "mismatch vs reference"

    print("KERNEL_OK")
</pallas_src>

<mosaic_0001>
module attributes {stable_mosaic.version = 11 : i64} {
  func.func @mlp_kernel(%arg0: i32, %arg1: memref<8x128xf32, #tpu.memory_space<vmem>>, %arg2: memref<128x320xf32, #tpu.memory_space<vmem>>, %arg3: memref<1x320xf32, #tpu.memory_space<vmem>>, %arg4: memref<320x96xf32, #tpu.memory_space<vmem>>, %arg5: memref<1x96xf32, #tpu.memory_space<vmem>>, %arg6: memref<8x96xf32, #tpu.memory_space<vmem>>) attributes {dimension_semantics = [#tpu.dimension_semantics<parallel>], iteration_bounds = array<i64: 1>, scalar_prefetch = 0 : i64, scratch_operands = 0 : i64, tpu.core_type = #tpu.core_type<tc>, window_params = [{transform_indices = @transform_0, window_bounds = array<i64: 8, 128>}, {pipeline_mode = #tpu.pipeline_mode<synchronous>, transform_indices = @transform_1, window_bounds = array<i64: 128, 320>}, {pipeline_mode = #tpu.pipeline_mode<synchronous>, transform_indices = @transform_2, window_bounds = array<i64: 1, 320>}, {pipeline_mode = #tpu.pipeline_mode<synchronous>, transform_indices = @transform_3, window_bounds = array<i64: 320, 96>}, {pipeline_mode = #tpu.pipeline_mode<synchronous>, transform_indices = @transform_4, window_bounds = array<i64: 1, 96>}, {transform_indices = @transform_5, window_bounds = array<i64: 8, 96>}]} {
    %c0 = arith.constant 0 : index
    %c0_0 = arith.constant 0 : index
    %0 = vector.load %arg1[%c0, %c0_0] : memref<8x128xf32, #tpu.memory_space<vmem>>, vector<8x128xf32>
    %c0_1 = arith.constant 0 : index
    %c0_2 = arith.constant 0 : index
    %1 = vector.load %arg2[%c0_1, %c0_2] : memref<128x320xf32, #tpu.memory_space<vmem>>, vector<128x320xf32>
    %cst = arith.constant dense<0.000000e+00> : vector<8x320xf32>
    %2 = tpu.matmul %0, %1, %cst {dimension_numbers = #tpu.dot_dimension_numbers<[1], [0], [0], [1], [0, 0, 1, 1], [], []>} : vector<8x128xf32>, vector<128x320xf32>, vector<8x320xf32> -> vector<8x320xf32>
    %c0_3 = arith.constant 0 : index
    %c0_4 = arith.constant 0 : index
    %3 = vector.load %arg3[%c0_3, %c0_4] : memref<1x320xf32, #tpu.memory_space<vmem>>, vector<1x320xf32>
    %4 = vector.broadcast %3 : vector<1x320xf32> to vector<8x320xf32>
    %5 = arith.addf %2, %4 : vector<8x320xf32>
    %cst_5 = arith.constant 0.000000e+00 : f32
    %6 = vector.broadcast %cst_5 : f32 to vector<8x320xf32>
    %7 = arith.maximumf %5, %6 : vector<8x320xf32>
    %c0_6 = arith.constant 0 : index
    %c0_7 = arith.constant 0 : index
    %8 = vector.load %arg4[%c0_6, %c0_7] : memref<320x96xf32, #tpu.memory_space<vmem>>, vector<320x96xf32>
    %cst_8 = arith.constant dense<0.000000e+00> : vector<8x96xf32>
    %9 = tpu.matmul %7, %8, %cst_8 {dimension_numbers = #tpu.dot_dimension_numbers<[1], [0], [0], [1], [0, 0, 1, 1], [], []>} : vector<8x320xf32>, vector<320x96xf32>, vector<8x96xf32> -> vector<8x96xf32>
    %c0_9 = arith.constant 0 : index
    %c0_10 = arith.constant 0 : index
    %10 = vector.load %arg5[%c0_9, %c0_10] : memref<1x96xf32, #tpu.memory_space<vmem>>, vector<1x96xf32>
    %11 = vector.broadcast %10 : vector<1x96xf32> to vector<8x96xf32>
    %12 = arith.addf %9, %11 : vector<8x96xf32>
    %c0_11 = arith.constant 0 : index
    %c0_12 = arith.constant 0 : index
    %13 = vector.load %arg6[%c0_11, %c0_12] : memref<8x96xf32, #tpu.memory_space<vmem>>, vector<8x96xf32>
    tpu.vector_store %arg6[%c0_11, %c0_12], %12 {strides = array<i32>} : memref<8x96xf32, #tpu.memory_space<vmem>>, vector<8x96xf32>,
    return
  }
  func.func @transform_0(%arg0: i32) -> (i32, i32) {
    %c0_i32 = arith.constant 0 : i32
    %c0_i32_0 = arith.constant 0 : i32
    return %arg0, %c0_i32 : i32, i32
  }
  func.func @transform_1(%arg0: i32) -> (i32, i32) {
    %c0_i32 = arith.constant 0 : i32
    %c0_i32_0 = arith.constant 0 : i32
    %c0_i32_1 = arith.constant 0 : i32
    return %c0_i32, %c0_i32_0 : i32, i32
  }
  func.func @transform_2(%arg0: i32) -> (i32, i32) {
    %c0_i32 = arith.constant 0 : i32
    %c0_i32_0 = arith.constant 0 : i32
    %c0_i32_1 = arith.constant 0 : i32
    return %c0_i32, %c0_i32_0 : i32, i32
  }
  func.func @transform_3(%arg0: i32) -> (i32, i32) {
    %c0_i32 = arith.constant 0 : i32
    %c0_i32_0 = arith.constant 0 : i32
    %c0_i32_1 = arith.constant 0 : i32
    return %c0_i32, %c0_i32_0 : i32, i32
  }
  func.func @transform_4(%arg0: i32) -> (i32, i32) {
    %c0_i32 = arith.constant 0 : i32
    %c0_i32_0 = arith.constant 0 : i32
    %c0_i32_1 = arith.constant 0 : i32
    return %c0_i32, %c0_i32_0 : i32, i32
  }
  func.func @transform_5(%arg0: i32) -> (i32, i32) {
    %c0_i32 = arith.constant 0 : i32
    %c0_i32_0 = arith.constant 0 : i32
    return %arg0, %c0_i32 : i32, i32
  }
}

</mosaic_0001>

<bundles_post_ra>
// kernel: net_forward.1
= control target key start
LH: loop header
LB: loop body
LE: loop exit
PB: predicated region body
PF: predicated region fallthrough
CT: control target
= control target key end

     0   :  { %v546_v3 = vmov 0.0   ;;  %vm547_vm0 = vmmov 0   ;;  %vm277_vm1 = vcmask 523264   ;;  %vm421_vm2 = vcmask 785408   ;;  %s883_s1 = inlined_call_operand.vmem [shape: f32[128,320], index: 1, kind: input, shape index: {}]   ;;  %s884_s0 = inlined_call_operand.vmem [shape: f32[8,128], index: 0, kind: input, shape index: {}]   ;;  %s885_s3 = inlined_call_operand.vmem [shape: f32[320,96], index: 3, kind: input, shape index: {}]   ;;  %s886_s2 = inlined_call_operand.vmem [shape: f32[1,320], index: 2, kind: input, shape index: {}]   ;;  %s887_s4 = inlined_call_operand.vmem [shape: f32[1,96], index: 4, kind: input, shape index: {}]   ;;  %s888_s5 = inlined_call_operand.vmem [shape: f32[8,96], index: 5, kind: output, shape index: {}]  }
   0x1   :  { %v67_v0 = vld [vmem:[%s883_s1 + $0x170] sm:$0xff]  ;;  %v66_v1 = vld [vmem:[%s883_s1 + $0x168] sm:$0xff]  ;;  %v64_v2 = vld [vmem:[%s883_s1 + $0x158] sm:$0xff]  ;;  %490 = vmatprep.subr.mxu1 %v546_v3  ;;  %150 = vmatprep.mubr.f32.mxu0 %v546_v3 }
   0x2   :  { %86 = vmatprep.subr.mxu0 %v67_v0  ;;  %v63_v4 = vld [vmem:[%s883_s1 + $0x150] sm:$0xff]  ;;  %522 = vmatprep.mubr.msk.f32.mxu1 %vm547_vm0, %v546_v3  ;;  %v61_v5 = vld [vmem:[%s883_s1 + $0x140] sm:$0xff]  ;;  %v60_v6 = vld [vmem:[%s883_s1 + $0x138] sm:$0xff] }
   0x3   :  { %87 = vmatpush1.msra.mxu0 %v66_v1  ;;  %v68_v7 = vld [vmem:[%s883_s1 + $0x178] sm:$0xff]  ;;  %v58_v8 = vld [vmem:[%s883_s1 + $0x128] sm:$0xff]  ;;  %v65_v9 = vld [vmem:[%s883_s1 + $0x160] sm:$0xff] }
   0x4   :  { %88 = vmatprep.subr.mxu0 %v64_v2  ;;  %491 = vmatpush3.msra.mxu1 %v68_v7  ;;  %v57_v10 = vld [vmem:[%s883_s1 + $0x120] sm:$0xff]  ;;  %v62_v11 = vld [vmem:[%s883_s1 + $0x148] sm:$0xff]  ;;  %v55_v12 = vld [vmem:[%s883_s1 + $0x110] sm:$0xff] }
   0x5   :  { %89 = vmatpush1.msra.mxu0 %v63_v4  ;;  %492 = vmatprep.subr.mxu1 %v546_v3  ;;  %v54_v13 = vld [vmem:[%s883_s1 + $0x108] sm:$0xff]  ;;  %v59_v14 = vld [vmem:[%s883_s1 + $0x130] sm:$0xff]  ;;  %v52_v15 = vld [vmem:[%s883_s1 + $0xf8] sm:$0xff] }
   0x6   :  { %90 = vmatprep.subr.mxu0 %v61_v5  ;;  %493 = vmatpush3.msra.mxu1 %v65_v9  ;;  %v51_v16 = vld [vmem:[%s883_s1 + $0xf0] sm:$0xff]  ;;  %v56_v17 = vld [vmem:[%s883_s1 + $0x118] sm:$0xff]  ;;  %v49_v18 = vld [vmem:[%s883_s1 + $0xe0] sm:$0xff] }
   0x7   :  { %91 = vmatpush1.msra.mxu0 %v60_v6  ;;  %494 = vmatprep.subr.mxu1 %v546_v3  ;;  %v48_v19 = vld [vmem:[%s883_s1 + $0xd8] sm:$0xff]  ;;  %v53_v20 = vld [vmem:[%s883_s1 + $0x100] sm:$0xff]  ;;  %v46_v21 = vld [vmem:[%s883_s1 + $0xc8] sm:$0xff] }
   0x8   :  { %92 = vmatprep.subr.mxu0 %v58_v8  ;;  %495 = vmatpush3.msra.mxu1 %v62_v11  ;;  %v45_v22 = vld [vmem:[%s883_s1 + $0xc0] sm:$0xff]  ;;  %v50_v23 = vld [vmem:[%s883_s1 + $0xe8] sm:$0xff]  ;;  %v43_v24 = vld [vmem:[%s883_s1 + $0xb0] sm:$0xff] }
   0x9   :  { %93 = vmatpush1.msra.mxu0 %v57_v10  ;;  %496 = vmatprep.subr.mxu1 %v546_v3  ;;  %v42_v25 = vld [vmem:[%s883_s1 + $0xa8] sm:$0xff]  ;;  %v47_v26 = vld [vmem:[%s883_s1 + $0xd0] sm:$0xff]  ;;  %v40_v27 = vld [vmem:[%s883_s1 + $0x98] sm:$0xff] }
   0xa   :  { %94 = vmatprep.subr.mxu0 %v55_v12  ;;  %497 = vmatpush3.msra.mxu1 %v59_v14  ;;  %v39_v28 = vld [vmem:[%s883_s1 + $0x90] sm:$0xff]  ;;  %v44_v29 = vld [vmem:[%s883_s1 + $0xb8] sm:$0xff]  ;;  %v37_v30 = vld [vmem:[%s883_s1 + $0x80] sm:$0xff] }
   0xb   :  { %95 = vmatpush1.msra.mxu0 %v54_v13  ;;  %498 = vmatprep.subr.mxu1 %v546_v3  ;;  %v36_v31 = vld [vmem:[%s883_s1 + $0x78] sm:$0xff]  ;;  %v41_v32 = vld [vmem:[%s883_s1 + $0xa0] sm:$0xff]  ;;  %v34_v33 = vld [vmem:[%s883_s1 + $0x68] sm:$0xff] }
   0xc   :  { %96 = vmatprep.subr.mxu0 %v52_v15  ;;  %499 = vmatpush3.msra.mxu1 %v56_v17  ;;  %v33_v34 = vld [vmem:[%s883_s1 + $0x60] sm:$0xff]  ;;  %v38_v35 = vld [vmem:[%s883_s1 + $0x88] sm:$0xff]  ;;  %v31_v36 = vld [vmem:[%s883_s1 + $0x50] sm:$0xff] }
   0xd   :  { %97 = vmatpush1.msra.mxu0 %v51_v16  ;;  %500 = vmatprep.subr.mxu1 %v546_v3  ;;  %v30_v37 = vld [vmem:[%s883_s1 + $0x48] sm:$0xff]  ;;  %v35_v38 = vld [vmem:[%s883_s1 + $0x70] sm:$0xff]  ;;  %v28_v39 = vld [vmem:[%s883_s1 + $0x38] sm:$0xff] }
   0xe   :  { %98 = vmatprep.subr.mxu0 %v49_v18  ;;  %501 = vmatpush3.msra.mxu1 %v53_v20  ;;  %v27_v40 = vld [vmem:[%s883_s1 + $0x30] sm:$0xff]  ;;  %v32_v41 = vld [vmem:[%s883_s1 + $0x58] sm:$0xff]  ;;  %v25_v42 = vld [vmem:[%s883_s1 + $0x20] sm:$0xff] }
   0xf   :  { %99 = vmatpush1.msra.mxu0 %v48_v19  ;;  %502 = vmatprep.subr.mxu1 %v546_v3  ;;  %v24_v43 = vld [vmem:[%s883_s1 + $0x18] sm:$0xff]  ;;  %v29_v44 = vld [vmem:[%s883_s1 + $0x40] sm:$0xff]  ;;  %v22_v45 = vld [vmem:[%s883_s1 + $0x8] sm:$0xff] }
  0x10   :  { %100 = vmatprep.subr.mxu0 %v46_v21  ;;  %503 = vmatpush3.msra.mxu1 %v50_v23  ;;  %v21_v46 = vld [vmem:[%s883_s1] sm:$0xff]  ;;  %v26_v47 = vld [vmem:[%s883_s1 + $0x28] sm:$0xff]  ;;  %v23_v49 = vld [vmem:[%s883_s1 + $0x10] sm:$0xff] }
  0x11   :  { %101 = vmatpush1.msra.mxu0 %v45_v22  ;;  %504 = vmatprep.subr.mxu1 %v546_v3  ;;  %v20_v48 = vld [vmem:[%s884_s0] sm:$0xff]  ;;  %v261_v50 = vld [vmem:[%s885_s3 + $0xf8] sm:$0xff]  ;;  %v260_v52 = vld [vmem:[%s885_s3 + $0xf0] sm:$0xff] }
  0x12   :  { %102 = vmatprep.subr.mxu0 %v43_v24  ;;  %505 = vmatpush3.msra.mxu1 %v47_v26  ;;  %v245_v51 = vld [vmem:[%s885_s3 + $0x78] sm:$0xff]  ;;  %v244_v53 = vld [vmem:[%s885_s3 + $0x70] sm:$0xff]  ;;  %v259_v55 = vld [vmem:[%s885_s3 + $0xe8] sm:$0xff] }
  0x13   :  { %103 = vmatpush1.msra.mxu0 %v42_v25  ;;  %506 = vmatprep.subr.mxu1 %v546_v3  ;;  %v269_v54 = vld [vmem:[%s885_s3 + $0x138] sm:$0xff]  ;;  %v243_v56 = vld [vmem:[%s885_s3 + $0x68] sm:$0xff]  ;;  %v268_v57 = vld [vmem:[%s885_s3 + $0x130] sm:$0xff] }
  0x14   :  { %104 = vmatprep.subr.mxu0 %v40_v27  ;;  %507 = vmatpush3.msra.mxu1 %v44_v29  ;;  %v258_v58 = vld [vmem:[%s885_s3 + $0xe0] sm:$0xff]  ;;  %v257_v60 = vld [vmem:[%s885_s3 + $0xd8] sm:$0xff]  ;;  %v256_v62 = vld [vmem:[%s885_s3 + $0xd0] sm:$0xff]  ;;  %v71_v27 = vlaneseq }
  0x15   :  { %105 = vmatpush1.msra.mxu0 %v39_v28  ;;  %508 = vmatprep.subr.mxu1 %v546_v3  ;;  %v242_v59 = vld [vmem:[%s885_s3 + $0x60] sm:$0xff]  ;;  %v241_v61 = vld [vmem:[%s885_s3 + $0x58] sm:$0xff]  ;;  %v240_v63 = vld [vmem:[%s885_s3 + $0x50] sm:$0xff] }
  0x16   :  { %106 = vmatprep.subr.mxu0 %v37_v30  ;;  %509 = vmatpush3.msra.mxu1 %v41_v32  ;;  %v255_v0 = vld [vmem:[%s885_s3 + $0xc8] sm:$0xff]  ;;  %v254_v2 = vld [vmem:[%s885_s3 + $0xc0] sm:$0xff]  ;;  %v253_v5 = vld [vmem:[%s885_s3 + $0xb8] sm:$0xff]  ;;  %v72_v28 = vshrl.u32 %v71_v27, 7 }
  0x17   :  { %107 = vmatpush1.msra.mxu0 %v36_v31  ;;  %510 = vmatprep.subr.mxu1 %v546_v3  ;;  %v239_v1 = vld [vmem:[%s885_s3 + $0x48] sm:$0xff]  ;;  %v238_v4 = vld [vmem:[%s885_s3 + $0x40] sm:$0xff]  ;;  %v237_v6 = vld [vmem:[%s885_s3 + $0x38] sm:$0xff] }
  0x18   :  { %108 = vmatprep.subr.mxu0 %v34_v33  ;;  %511 = vmatpush3.msra.mxu1 %v38_v35  ;;  %v252_v7 = vld [vmem:[%s885_s3 + $0xb0] sm:$0xff]  ;;  %v251_v9 = vld [vmem:[%s885_s3 + $0xa8] sm:$0xff]  ;;  %v250_v11 = vld [vmem:[%s885_s3 + $0xa0] sm:$0xff]  ;;  %v73_v29 = vsub.s32 0, %v72_v28  ;;  %v77_v31 = vsub.s32 1, %v72_v28  ;;  %v81_v32 = vsub.s32 2, %v72_v28 }
  0x19   :  { %109 = vmatpush1.msra.mxu0 %v33_v34  ;;  %512 = vmatprep.subr.mxu1 %v546_v3  ;;  %v236_v8 = vld [vmem:[%s885_s3 + $0x30] sm:$0xff]  ;;  %v235_v10 = vld [vmem:[%s885_s3 + $0x28] sm:$0xff]  ;;  %v234_v12 = vld [vmem:[%s885_s3 + $0x20] sm:$0xff] }
  0x1a   :  { %110 = vmatprep.subr.mxu0 %v31_v36  ;;  %513 = vmatpush3.msra.mxu1 %v35_v38  ;;  %v249_v13 = vld [vmem:[%s885_s3 + $0x98] sm:$0xff]  ;;  %v267_v15 = vld [vmem:[%s885_s3 + $0x128] sm:$0xff]  ;;  %v248_v16 = vld [vmem:[%s885_s3 + $0x90] sm:$0xff] }
  0x1b   :  { %111 = vmatpush1.msra.mxu0 %v30_v37  ;;  %514 = vmatprep.subr.mxu1 %v546_v3  ;;  %v233_v14 = vld [vmem:[%s885_s3 + $0x18] sm:$0xff]  ;;  %v232_v17 = vld [vmem:[%s885_s3 + $0x10] sm:$0xff]  ;;  %v266_v18 = vld [vmem:[%s885_s3 + $0x120] sm:$0xff] }
  0x1c   :  { %112 = vmatprep.subr.mxu0 %v28_v39  ;;  %515 = vmatpush3.msra.mxu1 %v32_v41  ;;  %v247_v19 = vld [vmem:[%s885_s3 + $0x88] sm:$0xff]  ;;  %v265_v21 = vld [vmem:[%s885_s3 + $0x118] sm:$0xff]  ;;  %v246_v22 = vld [vmem:[%s885_s3 + $0x80] sm:$0xff] }
  0x1d   :  { %113 = vmatpush1.msra.mxu0 %v27_v40  ;;  %516 = vmatprep.subr.mxu1 %v546_v3  ;;  %v231_v20 = vld [vmem:[%s885_s3 + $0x8] sm:$0xff]  ;;  %v230_v23 = vld [vmem:[%s885_s3] sm:$0xff]  ;;  %v264_v24 = vld [vmem:[%s885_s3 + $0x110] sm:$0xff] }
  0x1e   :  { %114 = vmatprep.subr.mxu0 %v25_v42  ;;  %517 = vmatpush3.msra.mxu1 %v29_v44  ;;  %v263_v25 = vld [vmem:[%s885_s3 + $0x108] sm:$0xff]  ;;  %v262_v26 = vld [vmem:[%s885_s3 + $0x100] sm:$0xff] }
  0x1f   :  { %115 = vmatpush1.msra.mxu0 %v24_v43  ;;  %518 = vmatprep.subr.mxu1 %v546_v3  ;;  %v69_v30 = vld [vmem:[%s886_s2] sm:$0x7] }
  0x20   :  { %116 = vmatprep.subr.mxu0 %v22_v45  ;;  %519 = vmatpush3.msra.mxu1 %v26_v47  ;;  %v74_v33 = vrot.slane %v69_v30, %v73_v29  ;;  %v78_v34 = vrot.slane %v69_v30, %v77_v31  ;;  %v82_v35 = vrot.slane %v69_v30, %v81_v32 }
  0x21   :  { %117 = vmatpush1.msra.mxu0 %v21_v46  ;;  %520 = vmatprep.subr.mxu1 %v546_v3 }
  0x22   :  { %151 = vmatmul.mubr.f32.vlgmr.msra.gmra.mxu0 %v20_v48  ;;  %521 = vmatpush3.msra.mxu1 %v23_v49  ;;  %v427_v49 = vld [vmem:[%s887_s4] ss:$0 sm:$0xff] }
  0x23   :  { %446 = vmatprep.subr.mxu0 %v261_v50  ;;  %523 = vmatmul.mubr.f32.vlgmr.msra.gmra.mxu1 %v20_v48 }
  0x24   :  { %447 = vmatpush3.msra.mxu0 %v245_v51  ;;  %525 = vmatprep.subr.mxu1 %v546_v3 }
  0x25   :  { %448 = vmatprep.subr.mxu0 %v260_v52  ;;  %526 = vmatpush3.msra.mxu1 %v269_v54 }
  0x26   :  { %449 = vmatpush3.msra.mxu0 %v244_v53  ;;  %527 = vmatprep.subr.mxu1 %v546_v3 }
  0x27   :  { %450 = vmatprep.subr.mxu0 %v259_v55  ;;  %528 = vmatpush3.msra.mxu1 %v268_v57 }
  0x28   :  { %451 = vmatpush3.msra.mxu0 %v243_v56  ;;  %529 = vmatprep.subr.mxu1 %v546_v3 }
  0x29   :  { %452 = vmatprep.subr.mxu0 %v258_v58  ;;  %541 = vmatprep.mubr.msk.f32.mxu1 %vm547_vm0, %v546_v3 }
  0x2a   :  { %453 = vmatpush3.msra.mxu0 %v242_v59  ;;  %530 = vmatpush3.msra.mxu1 %v267_v15 }
  0x2b   :  { %454 = vmatprep.subr.mxu0 %v257_v60  ;;  %531 = vmatprep.subr.mxu1 %v546_v3 }
  0x2c   :  { %455 = vmatpush3.msra.mxu0 %v241_v61  ;;  %532 = vmatpush3.msra.mxu1 %v266_v18 }
  0x2d   :  { %456 = vmatprep.subr.mxu0 %v256_v62  ;;  %533 = vmatprep.subr.mxu1 %v546_v3 }
  0x2e   :  { %457 = vmatpush3.msra.mxu0 %v240_v63  ;;  %534 = vmatpush3.msra.mxu1 %v265_v21 }
  0x2f   :  { %458 = vmatprep.subr.mxu0 %v255_v0  ;;  %535 = vmatprep.subr.mxu1 %v546_v3 }
  0x30   :  { %459 = vmatpush3.msra.mxu0 %v239_v1  ;;  %536 = vmatpush3.msra.mxu1 %v264_v24 }
  0x31   :  { %460 = vmatprep.subr.mxu0 %v254_v2  ;;  %537 = vmatprep.subr.mxu1 %v546_v3 }
  0x32   :  { %461 = vmatpush3.msra.mxu0 %v238_v4  ;;  %538 = vmatpush3.msra.mxu1 %v263_v25 }
  0x33   :  { %462 = vmatprep.subr.mxu0 %v253_v5  ;;  %539 = vmatprep.subr.mxu1 %v546_v3 }
  0x34   :  { %463 = vmatpush3.msra.mxu0 %v237_v6  ;;  %540 = vmatpush3.msra.mxu1 %v262_v26 }
  0x35   :  { %464 = vmatprep.subr.mxu0 %v252_v7 }
  0x36   :  { %465 = vmatpush3.msra.mxu0 %v236_v8 }
  0x37   :  { %466 = vmatprep.subr.mxu0 %v251_v9 }
  0x38   :  { %467 = vmatpush3.msra.mxu0 %v235_v10 }
  0x39   :  { %468 = vmatprep.subr.mxu0 %v250_v11 }
  0x3a   :  { %469 = vmatpush3.msra.mxu0 %v234_v12 }
  0x3b   :  { %470 = vmatprep.subr.mxu0 %v249_v13 }
  0x3c   :  { %471 = vmatpush3.msra.mxu0 %v233_v14 }
  0x3d   :  { %472 = vmatprep.subr.mxu0 %v248_v16 }
  0x3e   :  { %473 = vmatpush3.msra.mxu0 %v232_v17 }
  0x3f   :  { %474 = vmatprep.subr.mxu0 %v247_v19 }
  0x40   :  { %475 = vmatpush3.msra.mxu0 %v231_v20 }
  0x41   :  { %476 = vmatprep.subr.mxu0 %v246_v22 }
  0x42   :  { %477 = vmatpush3.msra.mxu0 %v230_v23 }
  0xe2   :  { %v152_v36 = vpop.f32.mrf.mxu0 }
  0xe3   :  { %v153_v37 = vadd.f32 %v152_v36, %v74_v33  ;;  %v223_v39 = vpop.f32.mrf.mxu1 }
  0xe4   :  { %v154_v38 = vpop.f32.mrf.mxu0  ;;  %v224_v41 = vadd.f32 %v223_v39, %v82_v35 }
  0xe5   :  { %v155_v40 = vadd.f32 %v154_v38, %v78_v34  ;;  %v524_v3 = vpop.f32.mrf.mxu1  ;;  %v227_v44 = vmax.f32 %v153_v37, 0.0 }
  0xe6   :  { %v229_v43 = vmax.f32 %v224_v41, 0.0 }
  0xe7   :  { %v228_v42 = vmax.f32 %v155_v40, 0.0 }
  0xe8   :  { %542 = vmatmul.mubr.msk.f32.vlgmr.msra.gmra.mxu1 %vm277_vm1, %v229_v43 }
  0xe9   :  { %345 = vmatprep.mubr.f32.mxu0 %v228_v42 }
  0xea   :  { %346 = vmatmul.mubr.f32.vlgmr.msra.gmra.mxu0 %v227_v44 }
 0x1a8   :  { %v417_v45 = vpop.f32.mrf.mxu1 }
 0x1aa   :  { %v478_v46 = vpop.f32.mrf.mxu0  ;;  %v543_v47 = vpop.f32.mrf.mxu1 }
 0x1ac   :  { %v479_v48 = vpop.f32.mrf.mxu0 }
 0x1ad   :  { %v480_v50 = vadd.f32 %v479_v48, %v478_v46 }
 0x1af   :  { %v348_v51 = vadd.f32 %v480_v50, %v427_v49 }
 0x1b1   :  { %v418_v52 = vadd.f32 %v417_v45, %v348_v51 }
 0x1b3   :  { %422 = vst.msk [vmem:[%s888_s5] sm:$0xff] %vm421_vm2, %v418_v52 }

</bundles_post_ra>
